<compile_context>
chip_gen: v6e
topology: v6e:2x2x1
jax: 0.10.0
libtpu: 0.0.40
codegen_flags: <defaults>
</compile_context>

<pallas_src>
import functools

import jax
import jax.numpy as jnp
from jax.experimental import pallas as pl
from jax.experimental.pallas import tpu as pltpu


# --------------------------------------------------------------------------
# Kernels
# --------------------------------------------------------------------------

def _outconv_kernel_vpu(x_ref, w_ref, b_ref, o_ref):
    """Small-channel path: VPU broadcast-FMA, weights/bias read from SMEM.

    x_ref: (C_in, thw)   VMEM
    w_ref: (C_out, C_in) SMEM
    b_ref: (C_out,)      SMEM
    o_ref: (C_out, thw)  VMEM
    """
    c_in = x_ref.shape[0]
    c_out = o_ref.shape[0]
    thw = x_ref.shape[1]

    # Chunk the lane dimension so only a few vregs are live at a time even
    # when thw is many thousands of lanes (keeps the big tiles spill-free).
    lane_chunk = 2048
    start = 0
    while start < thw:
        sz = min(lane_chunk, thw - start)
        x = x_ref[:, start:start + sz].astype(jnp.float32)
        # Hoist per-input-channel row slices out of the output-channel loop.
        x_rows = [x[ci:ci + 1, :] for ci in range(c_in)]
        for co in range(c_out):
            acc = x_rows[0] * w_ref[co, 0] + b_ref[co]
            for ci in range(1, c_in):
                acc = acc + x_rows[ci] * w_ref[co, ci]
            # Direct per-row store (lane-dense, no concatenate / XLU pack).
            o_ref[co:co + 1, start:start + sz] = acc.astype(o_ref.dtype)
        start += sz


def _outconv_kernel_mxu(x_ref, w_ref, b_ref, o_ref):
    """Generic path for larger channel counts: (C_out,C_in)@(C_in,thw) on MXU.

    x_ref: (C_in, thw)   VMEM
    w_ref: (C_out, C_in) VMEM (resident across grid steps)
    b_ref: (C_out, 1)    VMEM (resident across grid steps)
    o_ref: (C_out, thw)  VMEM
    """
    acc = jnp.dot(
        w_ref[...].astype(jnp.float32),
        x_ref[...].astype(jnp.float32),
        preferred_element_type=jnp.float32,
        precision=jax.lax.Precision.HIGHEST,  # full f32 parity; MXU has slack
    )
    o_ref[...] = (acc + b_ref[...].astype(jnp.float32)).astype(o_ref.dtype)


# --------------------------------------------------------------------------
# Wrapper
# --------------------------------------------------------------------------

def _vmem_capacity_bytes():
    """Physical VMEM of the current chip (fallback: 64 MiB, the v7x minimum)."""
    try:
        return int(pltpu.get_tpu_info().vmem_capacity_bytes)
    except Exception:
        return 64 * 1024 * 1024


def _pick_tile_hw(c_in, itemsize):
    """Pixel-tile size: ~2 MiB of input pixels per grid step, lane-aligned."""
    target_x_bytes = 2 * 1024 * 1024
    t = target_x_bytes // max(1, c_in * itemsize)
    t = max(1024, min(int(t), 32768))
    return (t // 128) * 128


@functools.partial(jax.jit, static_argnames=("tile_hw",))
def outconv(x_nchw, weight, bias, *, tile_hw=None):
    """1x1 Conv2d forward (PyTorch Conv2d kernel_size=1 semantics).

    x_nchw : (N, C_in, H, W)
    weight : (C_out, C_in, 1, 1)
    bias   : (C_out,)
    returns: (N, C_out, H, W), dtype of x
    """
    n, c_in, h, w = x_nchw.shape
    c_out = weight.shape[0]
    hw = h * w
    itemsize = jnp.dtype(x_nchw.dtype).itemsize

    if tile_hw is None:
        tile_hw = _pick_tile_hw(c_in, itemsize)
    assert tile_hw % 128 == 0, "pixel tile must be a multiple of 128 lanes"

    # No transposes / pads: NCHW -> (N, C_in, H*W) is a contiguous reshape.
    x3 = x_nchw.reshape(n, c_in, hw)
    w_mat = weight.reshape(c_out, c_in)

    # Pixel tile: full H*W if it fits, else a large multiple of 128.
    thw = hw if hw <= tile_hw else tile_hw
    num_tiles = -(-hw // thw)

    # v7x has two TensorCores: make sure there are at least 2 parallel steps.
    if n * num_tiles < 2 and hw >= 256:
        thw = ((-(-hw // 2)) + 127) // 128 * 128
        num_tiles = -(-hw // thw)

    grid = (n, num_tiles)

    x_spec = pl.BlockSpec((None, c_in, thw), lambda ni, ti: (ni, 0, ti))
    o_spec = pl.BlockSpec((None, c_out, thw), lambda ni, ti: (ni, 0, ti))

    small_channels = (c_in <= 8) and (c_out <= 8)
    if small_channels:
        kernel = _outconv_kernel_vpu
        w_arg, b_arg = w_mat, bias
        # Tiny weight/bias live in SMEM and are read as scalars in the kernel.
        w_spec = pl.BlockSpec(memory_space=pltpu.MemorySpace.SMEM)
        b_spec = pl.BlockSpec(memory_space=pltpu.MemorySpace.SMEM)
    else:
        kernel = _outconv_kernel_mxu
        w_arg, b_arg = w_mat, bias.reshape(c_out, 1)
        # Constant index_map -> weight/bias stay resident in VMEM across steps.
        w_spec = pl.BlockSpec((c_out, c_in), lambda ni, ti: (0, 0))
        b_spec = pl.BlockSpec((c_out, 1), lambda ni, ti: (0, 0))

    # VMEM budget: double-buffered x + out tiles (+ slack), clamped to ~75%
    # of physical VMEM so it stays safe on v7x's 64 MiB per TensorCore.
    x_tile_bytes = c_in * thw * itemsize
    o_tile_bytes = c_out * thw * itemsize
    needed = 2 * (x_tile_bytes + o_tile_bytes) + (1 << 20)
    vmem_limit = max(32 * 1024 * 1024, min(2 * needed, 96 * 1024 * 1024))
    vmem_limit = min(vmem_limit, int(0.75 * _vmem_capacity_bytes()))
    vmem_limit = int(max(vmem_limit, needed))

    out3 = pl.pallas_call(
        kernel,
        out_shape=jax.ShapeDtypeStruct((n, c_out, hw), x_nchw.dtype),
        grid_spec=pltpu.PrefetchScalarGridSpec(
            num_scalar_prefetch=0,
            grid=grid,
            in_specs=[x_spec, w_spec, b_spec],
            out_specs=o_spec,
        ),
        compiler_params=pltpu.CompilerParams(
            dimension_semantics=("parallel", "parallel"),
            vmem_limit_bytes=vmem_limit,
        ),
    )(x3, w_arg, b_arg)

    return out3.reshape(n, c_out, h, w)


# --------------------------------------------------------------------------
# Reference + tests
# --------------------------------------------------------------------------

def _ref_outconv(x, weight, bias):
    c_out, c_in = weight.shape[0], weight.shape[1]
    return (jnp.einsum("nihw,oi->nohw",
                       x.astype(jnp.float32),
                       weight.reshape(c_out, c_in).astype(jnp.float32),
                       precision=jax.lax.Precision.HIGHEST)
            + bias.astype(jnp.float32)[None, :, None, None])


if __name__ == "__main__":
    key = jax.random.PRNGKey(0)
    kx, kw, kb = jax.random.split(key, 3)

    # Test 1: shapes consistent with OutConv(in_channels=4, out_channels=3).
    N, C_IN, H, W = 2, 4, 16, 16
    C_OUT = 3
    x = jax.random.normal(kx, (N, C_IN, H, W), dtype=jnp.float32)
    weight = jax.random.normal(kw, (C_OUT, C_IN, 1, 1), dtype=jnp.float32) / jnp.sqrt(C_IN)
    bias = jax.random.normal(kb, (C_OUT,), dtype=jnp.float32) / jnp.sqrt(C_IN)

    y = outconv(x, weight, bias)
    jax.block_until_ready(y)
    assert y.shape == (N, C_OUT, H, W)
    assert jnp.allclose(y, _ref_outconv(x, weight, bias), atol=1e-5, rtol=1e-5)

    # Test 2: N=1, H*W=400 with an explicit small tile -> multi-tile grid with
    # a ragged last pixel tile (exercises block clipping + per-row stores).
    H2, W2 = 20, 20
    x2 = jax.random.normal(kx, (1, C_IN, H2, W2), dtype=jnp.float32)
    y2 = outconv(x2, weight, bias, tile_hw=128)
    jax.block_until_ready(y2)
    assert jnp.allclose(y2, _ref_outconv(x2, weight, bias), atol=1e-5, rtol=1e-5)

    # Test 3: N=1 with hw large enough to trigger the two-TensorCore split and
    # the chunked lane loop inside the VPU kernel (thw=4608 -> 3 chunks).
    H3, W3 = 96, 96
    x3 = jax.random.normal(kx, (1, C_IN, H3, W3), dtype=jnp.float32)
    y3 = outconv(x3, weight, bias)
    jax.block_until_ready(y3)
    assert jnp.allclose(y3, _ref_outconv(x3, weight, bias), atol=1e-5, rtol=1e-5)

    # Test 4: realistic UNet OutConv channel count (c_in=64) -> MXU path.
    C_IN4, C_OUT4 = 64, 3
    x4 = jax.random.normal(kx, (1, C_IN4, 16, 16), dtype=jnp.float32)
    w4 = jax.random.normal(kw, (C_OUT4, C_IN4, 1, 1), dtype=jnp.float32) / jnp.sqrt(C_IN4)
    b4 = jax.random.normal(kb, (C_OUT4,), dtype=jnp.float32) / jnp.sqrt(C_IN4)
    y4 = outconv(x4, w4, b4)
    jax.block_until_ready(y4)
    assert jnp.allclose(y4, _ref_outconv(x4, w4, b4), atol=1e-4, rtol=1e-4)

    # Test 5: bf16 input -> bf16 output (f32 compute in-register).
    x5 = x.astype(jnp.bfloat16)
    y5 = outconv(x5, weight, bias)
    jax.block_until_ready(y5)
    assert y5.dtype == jnp.bfloat16
    assert jnp.allclose(y5.astype(jnp.float32),
                        _ref_outconv(x5, weight, bias), atol=3e-2, rtol=3e-2)

    print("KERNEL_OK")
</pallas_src>

<mosaic_0001>
module attributes {stable_mosaic.version = 11 : i64} {
  func.func @_outconv_kernel_vpu(%arg0: i32, %arg1: i32, %arg2: memref<1x4x256xf32, #tpu.memory_space<vmem>>, %arg3: memref<3x4xf32, #tpu.memory_space<smem>>, %arg4: memref<3xf32, #tpu.memory_space<smem>>, %arg5: memref<1x3x256xf32, #tpu.memory_space<vmem>>) attributes {dimension_semantics = [#tpu.dimension_semantics<parallel>, #tpu.dimension_semantics<parallel>], iteration_bounds = array<i64: 2, 1>, scalar_prefetch = 0 : i64, scratch_operands = 0 : i64, tpu.core_type = #tpu.core_type<tc>, window_params = [{transform_indices = @transform_0, window_bounds = array<i64: 1, 4, 256>}, {transform_indices = @transform_1, window_bounds = array<i64: 3, 4>}, {transform_indices = @transform_2, window_bounds = array<i64: 3>}, {transform_indices = @transform_3, window_bounds = array<i64: 1, 3, 256>}]} {
    %c0 = arith.constant 0 : index
    %c0_0 = arith.constant 0 : index
    %c0_1 = arith.constant 0 : index
    %0 = vector.load %arg2[%c0, %c0_0, %c0_1] : memref<1x4x256xf32, #tpu.memory_space<vmem>>, vector<1x4x256xf32>
    %1 = vector.shape_cast %0 : vector<1x4x256xf32> to vector<4x256xf32>
    %2 = vector.extract_strided_slice %1 {offsets = [0, 0], sizes = [1, 256], strides = [1, 1]} : vector<4x256xf32> to vector<1x256xf32>
    %3 = vector.extract_strided_slice %1 {offsets = [1, 0], sizes = [1, 256], strides = [1, 1]} : vector<4x256xf32> to vector<1x256xf32>
    %4 = vector.extract_strided_slice %1 {offsets = [2, 0], sizes = [1, 256], strides = [1, 1]} : vector<4x256xf32> to vector<1x256xf32>
    %5 = vector.extract_strided_slice %1 {offsets = [3, 0], sizes = [1, 256], strides = [1, 1]} : vector<4x256xf32> to vector<1x256xf32>
    %c0_2 = arith.constant 0 : index
    %c0_3 = arith.constant 0 : index
    %6 = memref.load %arg3[%c0_2, %c0_3] : memref<3x4xf32, #tpu.memory_space<smem>>
    %7 = vector.broadcast %6 : f32 to vector<1x256xf32>
    %8 = arith.mulf %2, %7 : vector<1x256xf32>
    %c0_4 = arith.constant 0 : index
    %9 = memref.load %arg4[%c0_4] : memref<3xf32, #tpu.memory_space<smem>>
    %10 = vector.broadcast %9 : f32 to vector<1x256xf32>
    %11 = arith.addf %8, %10 : vector<1x256xf32>
    %c0_5 = arith.constant 0 : index
    %c1 = arith.constant 1 : index
    %12 = memref.load %arg3[%c0_5, %c1] : memref<3x4xf32, #tpu.memory_space<smem>>
    %13 = vector.broadcast %12 : f32 to vector<1x256xf32>
    %14 = arith.mulf %3, %13 : vector<1x256xf32>
    %15 = arith.addf %11, %14 : vector<1x256xf32>
    %c0_6 = arith.constant 0 : index
    %c2 = arith.constant 2 : index
    %16 = memref.load %arg3[%c0_6, %c2] : memref<3x4xf32, #tpu.memory_space<smem>>
    %17 = vector.broadcast %16 : f32 to vector<1x256xf32>
    %18 = arith.mulf %4, %17 : vector<1x256xf32>
    %19 = arith.addf %15, %18 : vector<1x256xf32>
    %c0_7 = arith.constant 0 : index
    %c3 = arith.constant 3 : index
    %20 = memref.load %arg3[%c0_7, %c3] : memref<3x4xf32, #tpu.memory_space<smem>>
    %21 = vector.broadcast %20 : f32 to vector<1x256xf32>
    %22 = arith.mulf %5, %21 : vector<1x256xf32>
    %23 = arith.addf %19, %22 : vector<1x256xf32>
    %c0_8 = arith.constant 0 : index
    %c0_9 = arith.constant 0 : index
    %c0_10 = arith.constant 0 : index
    %24 = vector.load %arg5[%c0_8, %c0_9, %c0_10] : memref<1x3x256xf32, #tpu.memory_space<vmem>>, vector<1x1x256xf32>
    %25 = vector.shape_cast %24 : vector<1x1x256xf32> to vector<1x256xf32>
    %26 = vector.shape_cast %23 : vector<1x256xf32> to vector<1x1x256xf32>
    tpu.vector_store %arg5[%c0_8, %c0_9, %c0_10], %26 {strides = array<i32>} : memref<1x3x256xf32, #tpu.memory_space<vmem>>, vector<1x1x256xf32>,
    %c1_11 = arith.constant 1 : index
    %c0_12 = arith.constant 0 : index
    %27 = memref.load %arg3[%c1_11, %c0_12] : memref<3x4xf32, #tpu.memory_space<smem>>
    %28 = vector.broadcast %27 : f32 to vector<1x256xf32>
    %29 = arith.mulf %2, %28 : vector<1x256xf32>
    %c1_13 = arith.constant 1 : index
    %30 = memref.load %arg4[%c1_13] : memref<3xf32, #tpu.memory_space<smem>>
    %31 = vector.broadcast %30 : f32 to vector<1x256xf32>
    %32 = arith.addf %29, %31 : vector<1x256xf32>
    %c1_14 = arith.constant 1 : index
    %c1_15 = arith.constant 1 : index
    %33 = memref.load %arg3[%c1_14, %c1_15] : memref<3x4xf32, #tpu.memory_space<smem>>
    %34 = vector.broadcast %33 : f32 to vector<1x256xf32>
    %35 = arith.mulf %3, %34 : vector<1x256xf32>
    %36 = arith.addf %32, %35 : vector<1x256xf32>
    %c1_16 = arith.constant 1 : index
    %c2_17 = arith.constant 2 : index
    %37 = memref.load %arg3[%c1_16, %c2_17] : memref<3x4xf32, #tpu.memory_space<smem>>
    %38 = vector.broadcast %37 : f32 to vector<1x256xf32>
    %39 = arith.mulf %4, %38 : vector<1x256xf32>
    %40 = arith.addf %36, %39 : vector<1x256xf32>
    %c1_18 = arith.constant 1 : index
    %c3_19 = arith.constant 3 : index
    %41 = memref.load %arg3[%c1_18, %c3_19] : memref<3x4xf32, #tpu.memory_space<smem>>
    %42 = vector.broadcast %41 : f32 to vector<1x256xf32>
    %43 = arith.mulf %5, %42 : vector<1x256xf32>
    %44 = arith.addf %40, %43 : vector<1x256xf32>
    %c0_20 = arith.constant 0 : index
    %c1_21 = arith.constant 1 : index
    %c0_22 = arith.constant 0 : index
    %45 = vector.load %arg5[%c0_20, %c1_21, %c0_22] : memref<1x3x256xf32, #tpu.memory_space<vmem>>, vector<1x1x256xf32>
    %46 = vector.shape_cast %45 : vector<1x1x256xf32> to vector<1x256xf32>
    %47 = vector.shape_cast %44 : vector<1x256xf32> to vector<1x1x256xf32>
    tpu.vector_store %arg5[%c0_20, %c1_21, %c0_22], %47 {strides = array<i32>} : memref<1x3x256xf32, #tpu.memory_space<vmem>>, vector<1x1x256xf32>,
    %c2_23 = arith.constant 2 : index
    %c0_24 = arith.constant 0 : index
    %48 = memref.load %arg3[%c2_23, %c0_24] : memref<3x4xf32, #tpu.memory_space<smem>>
    %49 = vector.broadcast %48 : f32 to vector<1x256xf32>
    %50 = arith.mulf %2, %49 : vector<1x256xf32>
    %c2_25 = arith.constant 2 : index
    %51 = memref.load %arg4[%c2_25] : memref<3xf32, #tpu.memory_space<smem>>
    %52 = vector.broadcast %51 : f32 to vector<1x256xf32>
    %53 = arith.addf %50, %52 : vector<1x256xf32>
    %c2_26 = arith.constant 2 : index
    %c1_27 = arith.constant 1 : index
    %54 = memref.load %arg3[%c2_26, %c1_27] : memref<3x4xf32, #tpu.memory_space<smem>>
    %55 = vector.broadcast %54 : f32 to vector<1x256xf32>
    %56 = arith.mulf %3, %55 : vector<1x256xf32>
    %57 = arith.addf %53, %56 : vector<1x256xf32>
    %c2_28 = arith.constant 2 : index
    %c2_29 = arith.constant 2 : index
    %58 = memref.load %arg3[%c2_28, %c2_29] : memref<3x4xf32, #tpu.memory_space<smem>>
    %59 = vector.broadcast %58 : f32 to vector<1x256xf32>
    %60 = arith.mulf %4, %59 : vector<1x256xf32>
    %61 = arith.addf %57, %60 : vector<1x256xf32>
    %c2_30 = arith.constant 2 : index
    %c3_31 = arith.constant 3 : index
    %62 = memref.load %arg3[%c2_30, %c3_31] : memref<3x4xf32, #tpu.memory_space<smem>>
    %63 = vector.broadcast %62 : f32 to vector<1x256xf32>
    %64 = arith.mulf %5, %63 : vector<1x256xf32>
    %65 = arith.addf %61, %64 : vector<1x256xf32>
    %c0_32 = arith.constant 0 : index
    %c2_33 = arith.constant 2 : index
    %c0_34 = arith.constant 0 : index
    %66 = vector.load %arg5[%c0_32, %c2_33, %c0_34] : memref<1x3x256xf32, #tpu.memory_space<vmem>>, vector<1x1x256xf32>
    %67 = vector.shape_cast %66 : vector<1x1x256xf32> to vector<1x256xf32>
    %68 = vector.shape_cast %65 : vector<1x256xf32> to vector<1x1x256xf32>
    tpu.vector_store %arg5[%c0_32, %c2_33, %c0_34], %68 {strides = array<i32>} : memref<1x3x256xf32, #tpu.memory_space<vmem>>, vector<1x1x256xf32>,
    return
  }
  func.func @transform_0(%arg0: i32, %arg1: i32) -> (i32, i32, i32) {
    %c0_i32 = arith.constant 0 : i32
    %c0_i32_0 = arith.constant 0 : i32
    return %arg0, %c0_i32, %arg1 : i32, i32, i32
  }
  func.func @transform_1(%arg0: i32, %arg1: i32) -> (i32, i32) {
    %c0_i32 = arith.constant 0 : i32
    %c0_i32_0 = arith.constant 0 : i32
    %c0_i32_1 = arith.constant 0 : i32
    return %c0_i32, %c0_i32_0 : i32, i32
  }
  func.func @transform_2(%arg0: i32, %arg1: i32) -> i32 {
    %c0_i32 = arith.constant 0 : i32
    %c0_i32_0 = arith.constant 0 : i32
    return %c0_i32 : i32
  }
  func.func @transform_3(%arg0: i32, %arg1: i32) -> (i32, i32, i32) {
    %c0_i32 = arith.constant 0 : i32
    %c0_i32_0 = arith.constant 0 : i32
    return %arg0, %c0_i32, %arg1 : i32, i32, i32
  }
}

</mosaic_0001>

<bundles_post_ra>
// kernel: outconv.1
= control target key start
LH: loop header
LB: loop body
LE: loop exit
PB: predicated region body
PF: predicated region fallthrough
CT: control target
= control target key end

     0   :  { %8 = vsyncpa [#allocation3], 0  ;;  %s773_s0 = inlined_call_operand.vmem [shape: f32[2,4,256], index: 0, kind: input, shape index: {}]   ;;  %s774_s1 = inlined_call_operand.vmem [shape: f32[3,4], index: 1, kind: input, shape index: {}]   ;;  %s775_s2 = inlined_call_operand.vmem [shape: f32[3], index: 2, kind: input, shape index: {}]   ;;  %s776_s3 = inlined_call_operand.vmem [shape: f32[2,3,256], index: 3, kind: output, shape index: {}]  }
   0x1   :  { %9 = vsyncpa [#allocation5], 0  ;;  %s666_s12 = smov 0   ;;  %s668_s13 = smov 0  }
   0x2   :  { %s670_s14 = smov 0  }
   0x3 LB: > { %s494_s15 = sadd.s32 4294967295, %s641_s14   ;;  %s27_s16 = sadd.s32 1, %s637_s13  ;;  %s641_s14 = sphi %s670_s14, %s15_s14   ;;  %s637_s13 = sphi %s668_s13, %s788_s13   ;;  %s633_s12 = sphi %s666_s12, %s787_s12  }
   0x4   : > { %p29_p0 = scmp.ge.s32.totalorder %s27_s16, 2  ;;  %p496_p1 = scmp.ge.s32.totalorder %s641_s14, 1 }
   0x5   : > { %p130_p2 = scmp.lt.s32.totalorder %s641_s14, 3  ;;  %p691_p4 = scmp.eq.s32.totalorder %s494_s15, 0 }
   0x6   : > { %s790_s16 = smov (%p29_p0, %s27_s16), 0  ;;  %s143_s21 = sshll.u32 %s774_s1, 4  ;;  %s144_s21 = int_to_ptr.vmem [resolvable:$true] %s143_s21 }
   0x7   : > { %p687_p3 = pnand %p496_p1, %p130_p2  ;;  %s154_s24 = sshll.u32 %s775_s2, 4  ;;  %s155_s24 = int_to_ptr.vmem [resolvable:$true] %s154_s24 }
   0x8   : > { %s781_s18 = scalar_select %p691_p4, 1, 0 }
   0x9   : > { %s780_s17 = scalar_select %p687_p3, 1, 0 }
   0xa   : > { %p543_p5 = pneg %p687_p3  ;;  %s581_s26 = scalar_lea.vmem %s144_s21, 64 }
   0xb   : > { %p582_p7 = scmp.ne.s32.totalorder %s144_s21, %s581_s26  ;;  %p589_p11 = scmp.lt.s32.totalorder %s144_s21, %s144_s21 }
   0xc   : > { %p705_p6 = pnand %p691_p4, %p543_p5  ;;  %p590_p12 = scmp.lt.s32.totalorder %s581_s26, %s581_s26 }
   0xe   : > { %p583_p8 = pneg %p705_p6  ;;  %p591_p13 = por %p590_p12, %p589_p11 }
  0x10   : > { %p584_p9 = pnand %p583_p8, %p582_p7 }
  0x12   : > { %p585_p10 = pneg %p584_p9 }
  0x14   : > { %p592_p0 = pnand %p591_p13, %p585_p10 }
  0x16   : > { %595 = shalt.err (!%p592_p0)
}
  0x17   : > { %s643_s27 = smov [#allocation2]   ;;  %s596_s28 = scalar_lea.vmem %s155_s24, 16 }
  0x18   : > { %546 = dma.vmem_to_smem (!%p705_p6), %s144_s21, 64, %s643_s27, [#allocation3]  }
  0x19   : > { %p597_p1 = scmp.ne.s32.totalorder %s155_s24, %s596_s28  ;;  %p604_p4 = scmp.lt.s32.totalorder %s155_s24, %s155_s24 }
  0x1a   : > { %p605_p3 = scmp.lt.s32.totalorder %s596_s28, %s596_s28 }
  0x1b   : > { %p599_p2 = pnand %p597_p1, %p583_p8 }
  0x1c   : > { %p606_p7 = por %p605_p3, %p604_p4 }
  0x1d   : > { %p600_p5 = pneg %p599_p2 }
  0x1f   : > { %p607_p9 = pnand %p606_p7, %p600_p5 }
  0x21   : > { %610 = shalt.err (!%p607_p9)
}
  0x22   : > { %s644_s29 = smov [#allocation4]   ;;  %p783_p10 = scmp.ne.s32.totalorder %s780_s17, 0 }
  0x23   : > { %549 = dma.vmem_to_smem (!%p705_p6), %s155_s24, 16, %s644_s29, [#allocation5]  }
  0x24   : > { %180 = sbr.rel (%p783_p10) target bundleno = 80 (0x50), region = 32  ;;  %p784_p11 = scmp.ne.s32.totalorder (!%p783_p10), %s781_s18, 0 }
  0x29   : > { %624 = dma.done.wait (%p784_p11), [#allocation3], 64  }
  0x2a   : > { %626 = vsyncadd (%p784_p11), [#allocation3], 4294967232 }
  0x2b   : > { %628 = dma.done.wait (%p784_p11), [#allocation5], 16  }
  0x2c   : > { %630 = vsyncadd (%p784_p11), [#allocation5], 4294967280 }
  0x2d   : > { %190 = sfence }
  0x2e   : > { %p218_p3 = scmp.lt.s32.totalorder %s633_s12, 1  ;;  %s238_s30 = sld [smem:[#allocation2]]  ;;  %v645_v4 = vmov 1966171168   ;;  %v272_v6 = vlaneseq }
  0x2f   : > { %s241_s4 = sld [smem:[#allocation4]]  ;;  %v270_v5 = vunpack.c.l.s4 %v645_v4 }
  0x30   : > { %s792_s12 = smov (!%p218_p3, %s633_s12), 1  ;;  %s507_s5 = sld [smem:[#allocation2 + $0x1]]  ;;  %v273_v13 = vshrl.u32 %v272_v6, 7  ;;  %vm751_vm0 = vcmp.lt.s32.totalorder %v272_v6, 256 }
  0x31   : > { %s533_s6 = sshll.u32 %s792_s12, 3  ;;  %s509_s7 = sld [smem:[#allocation2 + $0x2]]  ;;  %v271_v12 = vunpack.c.0.s8 %v270_v5 }
  0x32   : > { %s225_s10 = scalar_lea.vmem %s773_s0, %s533_s6  ;;  %s511_s11 = sld [smem:[#allocation2 + $0x3]] }
  0x33   : > { %v735_v0 = vld [vmem:[%s225_s10] sm:$0xff]  ;;  %s513_s15 = sld [smem:[#allocation2 + $0x80]]  ;;  %v274_v23 = vsub.s32 %v271_v12, %v273_v13  ;;  %s235_s28 = scalar_lea.vmem %s776_s3, %s533_s6 }
  0x34   : > { %v239_v1 = vstv %s238_s30  ;;  %s514_s17 = sld [smem:[#allocation4 + $0x1]] }
  0x35   : > { %v240_v2 = vmul.f32 %v239_v1, %v735_v0  ;;  %v242_v3 = vstv %s241_s4  ;;  %s515_s18 = sld [smem:[#allocation2 + $0x81]] }
  0x36   : > { %v245_v7 = vstv %s507_s5  ;;  %s517_s19 = sld [smem:[#allocation2 + $0x82]] }
  0x37   : > { %v243_v8 = vadd.f32 %v242_v3, %v240_v2  ;;  %v246_v9 = vmul.f32 %v245_v7, %v735_v0  ;;  %v253_v10 = vstv %s509_s7  ;;  %s519_s20 = sld [smem:[#allocation2 + $0x83]] }
  0x38   : > { %v254_v11 = vmul.f32 %v253_v10, %v735_v0  ;;  %v261_v15 = vstv %s511_s11  ;;  %s522_s21 = sld [smem:[#allocation2 + $0x100]] }
  0x39   : > { %v508_v14 = vrot.slane %v246_v9, 9  ;;  %v262_v17 = vmul.f32 %v261_v15, %v735_v0  ;;  %v290_v18 = vstv %s513_s15  ;;  %s523_s22 = sld [smem:[#allocation4 + $0x2]] }
  0x3a   : > { %v510_v16 = vrot.slane %v254_v11, 10  ;;  %v291_v20 = vmul.f32 %v290_v18, %v735_v0  ;;  %v293_v21 = vstv %s514_s17  ;;  %s524_s23 = sld [smem:[#allocation2 + $0x101]] }
  0x3b   : > { %v251_v19 = vadd.f32 %v508_v14, %v243_v8  ;;  %v512_v22 = vrot.slane %v262_v17, 11  ;;  %v296_v24 = vstv %s515_s18  ;;  %s526_s24 = sld [smem:[#allocation2 + $0x102]] }
  0x3c   : > { %v294_v26 = vadd.f32 %v293_v21, %v291_v20  ;;  %v297_v27 = vmul.f32 %v296_v24, %v735_v0  ;;  %v304_v28 = vstv %s517_s19  ;;  %s528_s25 = sld [smem:[#allocation2 + $0x103]] }
  0x3d   : > { %v259_v25 = vadd.f32 %v510_v16, %v251_v19  ;;  %v305_v29 = vmul.f32 %v304_v28, %v735_v0  ;;  %v312_v30 = vstv %s519_s20 }
  0x3e   : > { %v516_v32 = vrot.slane %v297_v27, 9  ;;  %v313_v33 = vmul.f32 %v312_v30, %v735_v0  ;;  %v338_v34 = vstv %s522_s21 }
  0x3f   : > { %v267_v31 = vadd.f32 %v512_v22, %v259_v25  ;;  %v518_v35 = vrot.slane %v305_v29, 10  ;;  %v339_v36 = vmul.f32 %v338_v34, %v735_v0  ;;  %v341_v37 = vstv %s523_s22 }
  0x40   : > { %v302_v39 = vadd.f32 %v516_v32, %v294_v26  ;;  %v520_v40 = vrot.slane %v313_v33, 11  ;;  %v344_v41 = vstv %s524_s23 }
  0x41   : > { %v275_v38 = vrot.slane %v267_v31, %v274_v23  ;;  %v342_v43 = vadd.f32 %v341_v37, %v339_v36  ;;  %v345_v44 = vmul.f32 %v344_v41, %v735_v0  ;;  %v352_v45 = vstv %s526_s24 }
  0x42   : > { %v310_v47 = vadd.f32 %v518_v35, %v302_v39  ;;  %v353_v48 = vmul.f32 %v352_v45, %v735_v0  ;;  %v360_v49 = vstv %s528_s25 }
  0x43   : > { %v282_v46 = vrot.slane %v275_v38, %v274_v23  ;;  %v525_v50 = vrot.slane %v345_v44, 9  ;;  %v361_v51 = vmul.f32 %v360_v49, %v735_v0 }
  0x44   : > { %v318_v52 = vadd.f32 %v520_v40, %v310_v47  ;;  %v527_v53 = vrot.slane %v353_v48, 10 }
  0x45   : > { %288 = vst.msk [vmem:[%s235_s28] ss:$4 sm:$0x3] %vm751_vm0, %v282_v46  ;;  %v350_v54 = vadd.f32 %v525_v50, %v342_v43  ;;  %v529_v55 = vrot.slane %v361_v51, 11 }
  0x46   : > { %v326_v56 = vrot.slane %v318_v52, %v274_v23 }
  0x47   : > { %v358_v57 = vadd.f32 %v527_v53, %v350_v54 }
  0x48   : > { %v333_v58 = vrot.slane %v326_v56, %v274_v23 }
  0x49   : > { %v366_v59 = vadd.f32 %v529_v55, %v358_v57 }
  0x4a   : > { %521 = vst.msk [vmem:[%s235_s28 + $0x1] ss:$4 sm:$0x3] %vm751_vm0, %v333_v58 }
  0x4b   : > { %v374_v60 = vrot.slane %v366_v59, %v274_v23 }
  0x4d   : > { %v381_v61 = vrot.slane %v374_v60, %v274_v23 }
  0x4f   : > { %530 = vst.msk [vmem:[%s235_s28 + $0x2] ss:$4 sm:$0x3] %vm751_vm0, %v381_v61 }
  0x50 PF: > { %s15_s14 = sadd.s32 1, %s641_s14   ;;  %s787_s12 = smov %s637_s13 }
  0x51   : > { %p12_p4 = scmp.ge.s32.totalorder %s15_s14, 4   ;;  %s788_s13 = smov %s790_s16 }
  0x53   :  { %14 = sbr.rel (!%p12_p4) target bundleno = 3 (0x3), region = 73 }
  0x58   :  { %415 = vsyncpa [#allocation3], 1 }
  0x59   :  { %417 = vsyncpa [#allocation3 + $0x1], 1 }
  0x5a   :  { %418 = vsyncpa [#allocation5], 1 }

</bundles_post_ra>
